<compile_context>
chip_gen: v5e
topology: v5e:2x2
jax: 0.10.0
libtpu: 0.0.40
codegen_flags: <defaults>
</compile_context>

<pallas_src>
import numpy as np
import jax
import jax.numpy as jnp
from jax.experimental import pallas as pl
from jax.experimental.pallas import tpu as pltpu

VMEM_LIMIT = 32 * 1024 * 1024


def _info_nce_2_kernel(nce_ref, s_ref, posw_ref, negw_ref, colw_ref, o_ref):
    j = pl.program_id(0)

    @pl.when(j == 0)
    def _():
        o_ref[...] = jnp.zeros_like(o_ref)

    inv_nce = 1.0 / nce_ref[0]                    # scalar from SMEM
    e = jnp.exp(s_ref[...] * inv_nce)             # (N, TM) f32
    # sum over the labels==0 rows (the broadcast-add loop of the reference)
    sum_neg = jnp.sum(e * negw_ref[...], axis=0, keepdims=True)       # (1, TM)
    term = -jnp.log(e / (e + sum_neg))            # (N, TM)
    # keep labels==1 rows and real (non-pad) columns; colw carries 1/M0
    partial = jnp.sum(term * (posw_ref[...] * colw_ref[...]))
    o_ref[...] = o_ref[...] + partial

    @pl.when(j == pl.num_programs(0) - 1)
    def _():
        n_pos = jnp.sum(posw_ref[...])            # number of labels==1 rows
        o_ref[...] = o_ref[...] / n_pos           # mean over (n_pos, M0)


def _round_up(x, m):
    return (x + m - 1) // m * m


@jax.jit
def info_nce_2(sims_1, sims_0, labels, nce):
    """Pallas-fused InfoNce_2.forward.

    sims_1: (N, M) similarity matrix, labels: (N,), nce: scalar temperature.
    sims_0 is accepted (and ignored) to match the reference signature.
    """
    del sims_0  # TODO(synk): new_sim_0 = exp(sims_0/nce) is dead code in the reference.
    sims_1 = jnp.asarray(sims_1, jnp.float32)
    if sims_1.ndim == 1:
        sims_1 = sims_1[:, None]
    labels = jnp.asarray(labels)
    N0, M0 = sims_1.shape

    # Pad to sublane/lane-dense shapes; padded rows/cols get zero weight.
    N = max(_round_up(N0, 8), 8)
    M = max(_round_up(M0, 128), 128)
    if M <= 512:
        TM = M
    else:
        TM = next(c for c in (512, 256, 128) if M % c == 0)

    s_pad = jnp.zeros((N, M), jnp.float32).at[:N0, :M0].set(sims_1)
    posw = jnp.zeros((N, 1), jnp.float32).at[:N0, 0].set(
        (labels == 1).astype(jnp.float32))
    negw = jnp.zeros((N, 1), jnp.float32).at[:N0, 0].set(
        (labels == 0).astype(jnp.float32))
    colw = jnp.zeros((1, M), jnp.float32).at[0, :M0].set(1.0 / M0)
    nce_arr = jnp.asarray(nce, jnp.float32).reshape(1)

    loss = pl.pallas_call(
        _info_nce_2_kernel,
        out_shape=jax.ShapeDtypeStruct((1, 1), jnp.float32),
        grid=(M // TM,),
        in_specs=[
            pl.BlockSpec(memory_space=pltpu.MemorySpace.SMEM),   # nce (scalar)
            pl.BlockSpec((N, TM), lambda j: (0, j)),             # sims_1 column tile
            pl.BlockSpec((N, 1), lambda j: (0, 0)),              # labels==1 row weights
            pl.BlockSpec((N, 1), lambda j: (0, 0)),              # labels==0 row weights
            pl.BlockSpec((1, TM), lambda j: (0, j)),             # column weights (1/M0)
        ],
        out_specs=pl.BlockSpec((1, 1), lambda j: (0, 0)),        # resident accumulator
        compiler_params=pltpu.CompilerParams(
            dimension_semantics=("arbitrary",),
            vmem_limit_bytes=VMEM_LIMIT),
    )(nce_arr, s_pad, posw, negw, colw)
    return loss[0, 0]


if __name__ == "__main__":
    key = jax.random.PRNGKey(0)
    k1, k2 = jax.random.split(key)

    # Small shapes consistent with the caller: an (B, B) sims matrix, B=8,
    # cosine-similarity-range values, temperature nce = 0.07.
    B = 8
    sims_1 = jax.random.uniform(k1, (B, B), jnp.float32, -1.0, 1.0)
    sims_0 = jax.random.uniform(k2, (B, B), jnp.float32, -1.0, 1.0)
    labels = jnp.array([1, 0, 1, 0, 2, 1, 0, 0], jnp.int32)  # label 2 is ignored, as in ref
    nce = 0.07

    loss = info_nce_2(sims_1, sims_0, labels, nce)
    jax.block_until_ready(loss)

    # Pure-JAX reference mirroring the PyTorch forward literally (eager mode:
    # boolean indexing + python loop over the labels==0 rows).
    new1 = jnp.exp(sims_1 / nce)
    lab_np = np.asarray(labels)
    pos = new1[lab_np == 1]
    s = pos
    for row in new1[lab_np == 0]:
        s = s + row
    ref = jnp.mean(-jnp.log(pos / s))

    assert bool(jnp.isfinite(loss)), loss
    assert np.allclose(np.asarray(loss), np.asarray(ref), rtol=2e-4, atol=1e-4), (loss, ref)
    print("KERNEL_OK")
</pallas_src>

<mosaic_0001>
module attributes {stable_mosaic.version = 11 : i64} {
  func.func @_info_nce_2_kernel(%arg0: i32, %arg1: memref<1xf32, #tpu.memory_space<smem>>, %arg2: memref<8x128xf32, #tpu.memory_space<vmem>>, %arg3: memref<8x1xf32, #tpu.memory_space<vmem>>, %arg4: memref<8x1xf32, #tpu.memory_space<vmem>>, %arg5: memref<1x128xf32, #tpu.memory_space<vmem>>, %arg6: memref<1x1xf32, #tpu.memory_space<vmem>>) attributes {dimension_semantics = [#tpu.dimension_semantics<arbitrary>], iteration_bounds = array<i64: 1>, scalar_prefetch = 0 : i64, scratch_operands = 0 : i64, tpu.core_type = #tpu.core_type<tc>, window_params = [{transform_indices = @transform_0, window_bounds = array<i64: 1>}, {transform_indices = @transform_1, window_bounds = array<i64: 8, 128>}, {pipeline_mode = #tpu.pipeline_mode<synchronous>, transform_indices = @transform_2, window_bounds = array<i64: 8, 1>}, {pipeline_mode = #tpu.pipeline_mode<synchronous>, transform_indices = @transform_3, window_bounds = array<i64: 8, 1>}, {transform_indices = @transform_4, window_bounds = array<i64: 1, 128>}, {pipeline_mode = #tpu.pipeline_mode<synchronous>, transform_indices = @transform_5, window_bounds = array<i64: 1, 1>}]} {
    %c0_i32 = arith.constant 0 : i32
    %0 = arith.cmpi eq, %arg0, %c0_i32 : i32
    %1 = arith.extui %0 : i1 to i32
    %c0_i32_0 = arith.constant 0 : i32
    %2 = arith.cmpi ne, %1, %c0_i32_0 : i32
    scf.if %2 {
      %cst_18 = arith.constant 0.000000e+00 : f32
      %37 = vector.broadcast %cst_18 : f32 to vector<1x1xf32>
      %c0_19 = arith.constant 0 : index
      %c0_20 = arith.constant 0 : index
      %38 = vector.load %arg6[%c0_19, %c0_20] : memref<1x1xf32, #tpu.memory_space<vmem>>, vector<1x1xf32>
      tpu.vector_store %arg6[%c0_19, %c0_20], %37 {strides = array<i32>} : memref<1x1xf32, #tpu.memory_space<vmem>>, vector<1x1xf32>,
    } else {
    }
    %c0 = arith.constant 0 : index
    %3 = memref.load %arg1[%c0] : memref<1xf32, #tpu.memory_space<smem>>
    %cst = arith.constant 1.000000e+00 : f32
    %4 = arith.divf %cst, %3 : f32
    %c0_1 = arith.constant 0 : index
    %c0_2 = arith.constant 0 : index
    %5 = vector.load %arg2[%c0_1, %c0_2] : memref<8x128xf32, #tpu.memory_space<vmem>>, vector<8x128xf32>
    %6 = vector.broadcast %4 : f32 to vector<8x128xf32>
    %7 = arith.mulf %5, %6 : vector<8x128xf32>
    %8 = math.exp %7 : vector<8x128xf32>
    %c0_3 = arith.constant 0 : index
    %c0_4 = arith.constant 0 : index
    %9 = vector.load %arg4[%c0_3, %c0_4] : memref<8x1xf32, #tpu.memory_space<vmem>>, vector<8x1xf32>
    %10 = vector.broadcast %9 : vector<8x1xf32> to vector<8x128xf32>
    %11 = arith.mulf %8, %10 : vector<8x128xf32>
    %cst_5 = arith.constant dense<0.000000e+00> : vector<128xf32>
    %12 = vector.multi_reduction <add>, %11, %cst_5 [0] : vector<8x128xf32> to vector<128xf32>
    %13 = vector.shape_cast %12 : vector<128xf32> to vector<1x128xf32>
    %14 = vector.broadcast %13 : vector<1x128xf32> to vector<8x128xf32>
    %15 = arith.addf %8, %14 : vector<8x128xf32>
    %16 = arith.divf %8, %15 : vector<8x128xf32>
    %17 = math.log %16 : vector<8x128xf32>
    %cst_6 = arith.constant 0.000000e+00 : f32
    %18 = vector.broadcast %cst_6 : f32 to vector<8x128xf32>
    %19 = arith.subf %18, %17 : vector<8x128xf32>
    %c0_7 = arith.constant 0 : index
    %c0_8 = arith.constant 0 : index
    %20 = vector.load %arg3[%c0_7, %c0_8] : memref<8x1xf32, #tpu.memory_space<vmem>>, vector<8x1xf32>
    %c0_9 = arith.constant 0 : index
    %c0_10 = arith.constant 0 : index
    %21 = vector.load %arg5[%c0_9, %c0_10] : memref<1x128xf32, #tpu.memory_space<vmem>>, vector<1x128xf32>
    %22 = vector.broadcast %20 : vector<8x1xf32> to vector<8x128xf32>
    %23 = vector.broadcast %21 : vector<1x128xf32> to vector<8x128xf32>
    %24 = arith.mulf %22, %23 : vector<8x128xf32>
    %25 = arith.mulf %19, %24 : vector<8x128xf32>
    %26 = vector.shape_cast %25 : vector<8x128xf32> to vector<1x8x128xf32>
    %cst_11 = arith.constant dense<0.000000e+00> : vector<1xf32>
    %27 = vector.multi_reduction <add>, %26, %cst_11 [1, 2] : vector<1x8x128xf32> to vector<1xf32>
    %28 = vector.shape_cast %27 : vector<1xf32> to vector<1x1x1xf32>
    %29 = vector.extract %28[0, 0, 0] : f32 from vector<1x1x1xf32>
    %c0_12 = arith.constant 0 : index
    %c0_13 = arith.constant 0 : index
    %30 = vector.load %arg6[%c0_12, %c0_13] : memref<1x1xf32, #tpu.memory_space<vmem>>, vector<1x1xf32>
    %31 = vector.broadcast %29 : f32 to vector<1x1xf32>
    %32 = arith.addf %30, %31 : vector<1x1xf32>
    %c0_14 = arith.constant 0 : index
    %c0_15 = arith.constant 0 : index
    %33 = vector.load %arg6[%c0_14, %c0_15] : memref<1x1xf32, #tpu.memory_space<vmem>>, vector<1x1xf32>
    tpu.vector_store %arg6[%c0_14, %c0_15], %32 {strides = array<i32>} : memref<1x1xf32, #tpu.memory_space<vmem>>, vector<1x1xf32>,
    %c0_i32_16 = arith.constant 0 : i32
    %34 = arith.cmpi eq, %arg0, %c0_i32_16 : i32
    %35 = arith.extui %34 : i1 to i32
    %c0_i32_17 = arith.constant 0 : i32
    %36 = arith.cmpi ne, %35, %c0_i32_17 : i32
    scf.if %36 {
      %c0_18 = arith.constant 0 : index
      %c0_19 = arith.constant 0 : index
      %37 = vector.load %arg3[%c0_18, %c0_19] : memref<8x1xf32, #tpu.memory_space<vmem>>, vector<8x1xf32>
      %38 = vector.shape_cast %37 : vector<8x1xf32> to vector<1x8x1xf32>
      %cst_20 = arith.constant dense<0.000000e+00> : vector<1xf32>
      %39 = vector.multi_reduction <add>, %38, %cst_20 [1, 2] : vector<1x8x1xf32> to vector<1xf32>
      %40 = vector.shape_cast %39 : vector<1xf32> to vector<1x1x1xf32>
      %41 = vector.extract %40[0, 0, 0] : f32 from vector<1x1x1xf32>
      %c0_21 = arith.constant 0 : index
      %c0_22 = arith.constant 0 : index
      %42 = vector.load %arg6[%c0_21, %c0_22] : memref<1x1xf32, #tpu.memory_space<vmem>>, vector<1x1xf32>
      %43 = vector.broadcast %41 : f32 to vector<1x1xf32>
      %44 = arith.divf %42, %43 : vector<1x1xf32>
      %c0_23 = arith.constant 0 : index
      %c0_24 = arith.constant 0 : index
      %45 = vector.load %arg6[%c0_23, %c0_24] : memref<1x1xf32, #tpu.memory_space<vmem>>, vector<1x1xf32>
      tpu.vector_store %arg6[%c0_23, %c0_24], %44 {strides = array<i32>} : memref<1x1xf32, #tpu.memory_space<vmem>>, vector<1x1xf32>,
    } else {
    }
    return
  }
  func.func @transform_0(%arg0: i32) -> i32 {
    %c0_i32 = arith.constant 0 : i32
    %c0_i32_0 = arith.constant 0 : i32
    return %c0_i32 : i32
  }
  func.func @transform_1(%arg0: i32) -> (i32, i32) {
    %c0_i32 = arith.constant 0 : i32
    %c0_i32_0 = arith.constant 0 : i32
    return %c0_i32, %arg0 : i32, i32
  }
  func.func @transform_2(%arg0: i32) -> (i32, i32) {
    %c0_i32 = arith.constant 0 : i32
    %c0_i32_0 = arith.constant 0 : i32
    %c0_i32_1 = arith.constant 0 : i32
    return %c0_i32, %c0_i32_0 : i32, i32
  }
  func.func @transform_3(%arg0: i32) -> (i32, i32) {
    %c0_i32 = arith.constant 0 : i32
    %c0_i32_0 = arith.constant 0 : i32
    %c0_i32_1 = arith.constant 0 : i32
    return %c0_i32, %c0_i32_0 : i32, i32
  }
  func.func @transform_4(%arg0: i32) -> (i32, i32) {
    %c0_i32 = arith.constant 0 : i32
    %c0_i32_0 = arith.constant 0 : i32
    return %c0_i32, %arg0 : i32, i32
  }
  func.func @transform_5(%arg0: i32) -> (i32, i32) {
    %c0_i32 = arith.constant 0 : i32
    %c0_i32_0 = arith.constant 0 : i32
    %c0_i32_1 = arith.constant 0 : i32
    return %c0_i32, %c0_i32_0 : i32, i32
  }
}

</mosaic_0001>

<bundles_post_ra>
// kernel: info_nce_2.1
= control target key start
LH: loop header
LB: loop body
LE: loop exit
PB: predicated region body
PF: predicated region fallthrough
CT: control target
= control target key end

     0   :  { %v204_v2 = vmov 0   ;;  %s258_s0 = inlined_call_operand.<no memory space> [shape: f32[1], index: 0, kind: input, shape index: {}]   ;;  %s259_s1 = inlined_call_operand.vmem [shape: f32[8,128], index: 1, kind: input, shape index: {}]   ;;  %s260_s2 = inlined_call_operand.vmem [shape: f32[8,1], index: 2, kind: input, shape index: {}]   ;;  %s261_s3 = inlined_call_operand.vmem [shape: f32[8,1], index: 3, kind: input, shape index: {}]   ;;  %s262_s4 = inlined_call_operand.vmem [shape: f32[1,128], index: 4, kind: input, shape index: {}]   ;;  %s263_s5 = inlined_call_operand.hbm [shape: f32[1,1], index: 5, kind: output, shape index: {}]  }
   0x1   :  { %v50_v0 = vld [vmem:[%s261_s3] sm:$0xff]  ;;  %v29_v1 = vstv %s258_s0  ;;  %166 = vset.pattern.permute.xlu0 %v204_v2 }
   0x2   :  { %168 = vrcp.f32 %v29_v1 }
   0x3   :  { %11 = vsyncpa [#allocation4], 0  ;;  %53 = vperm.xlu0 %166, %v50_v0   ;;  %v82_v4 = vld [vmem:[%s260_s2] sm:$0xff]  ;;  %v41_v6 = vand.u32 2147483648, %v29_v1  ;;  %vm35_vm0 = vweird.f32 %v29_v1  ;;  %v39_v8 = vand.u32 2147483647, %v29_v1 }
   0x4   :  { %v45_v14 = vld [vmem:[%s259_s1] sm:$0xff]  ;;  %vm112_vm8 = vcmask 7168   ;;  %vm26_vm9 = vcmask 0   ;;  %v205_v47 = vmov 0.0   ;;  %s206_s26 = smov [#allocation3]   ;;  %s148_s30 = sshll.u32 %s263_s5, 4  ;;  %s149_s30 = int_to_ptr.hbm [resolvable:$true] %s148_s30 }
   0x5   :  { %v42_v10 = vor.u32 1.1754944e-38, %v41_v6  ;;  %vm40_vm3 = vcmp.eq.f32.partialorder %v39_v8, 8.507059e+37  ;;  %v167_v39 = vld [vmem:[%s262_s4] ss:$0 sm:$0xff]  ;;  %v113_v46 = vsel %vm112_vm8, %v82_v4, 0.0  ;;  %s146_s27 = sshll.u32 %s206_s26, 4  ;;  %s147_s27 = int_to_ptr.vmem [resolvable:$true] %s146_s27 }
   0x6   :  { %27 = vst.msk [vmem:[#allocation3] sm:$0x1] %vm26_vm9, %v205_v47 }
   0x8   :  { %v169_v3 = vpop.eup %168 }
   0x9   :  { %v31_v5 = vmul.f32 %v169_v3, %v29_v1  ;;  %vm36_vm1 = vweird.f32 %v169_v3 }
   0xa   :  { %vm37_vm2 = vmor %vm35_vm0, %vm36_vm1 }
   0xb   :  { %86 = vperm.xlu0 %166, %v82_v4   ;;  %v32_v7 = vsub.f32 1.0, %v31_v5 }
   0xd   :  { %v33_v9 = vmul.f32 %v169_v3, %v32_v7  ;;  %v103_v62 = vld [vmem:[#allocation3] sm:$0x1] }
   0xf   :  { %v34_v11 = vadd.f32 %v169_v3, %v33_v9 }
  0x11   :  { %v38_v12 = vsel %vm37_vm2, %v169_v3, %v34_v11 }
  0x12   :  { %v43_v13 = vsel %vm40_vm3, %v42_v10, %v38_v12 }
  0x13   :  { %157 = vpush %v43_v13 }
  0x44   :  { %s158_s0 = spop %157 }
  0x45   :  { %v46_v15 = vstv %s158_s0 }
  0x46   :  { %v47_v16 = vmul.f32 %v46_v15, %v45_v14 }
  0x48   :  { %v48_v17 = vmul.f32 1.442695, %v47_v16 }
  0x4a   :  { %170 = vpow2.f32 %v48_v17 }
  0x50   :  { %v171_v18 = vpop.eup %170 }
  0x75   :  { %v54_v19 = vpop.permute.xlu0 %53 }
  0x76   :  { %v56_v20 = vmul.f32 %v171_v18, %v54_v19 }
  0x78   :  { %v57_v21 = vrot.slane %v56_v20, 4 }
  0x7a   :  { %v58_v22 = vadd.f32 %v57_v21, %v56_v20 }
  0x7c   :  { %v59_v23 = vrot.slane %v58_v22, 2 }
  0x7d   :  { %v87_v41 = vpop.permute.xlu0 %86 }
  0x7e   :  { %v60_v24 = vadd.f32 %v59_v23, %v58_v22  ;;  %v92_v43 = vmul.f32 %v167_v39, %v87_v41 }
  0x80   :  { %v61_v25 = vrot.slane %v60_v24, 1 }
  0x82   :  { %v62_v26 = vadd.f32 %v61_v25, %v60_v24 }
  0x84   :  { %v63_v27 = vadd.f32 %v171_v18, %v62_v26 }
  0x86   :  { %172 = vrcp.f32 %v63_v27  ;;  %v75_v31 = vand.u32 2147483648, %v63_v27  ;;  %v73_v33 = vand.u32 2147483647, %v63_v27  ;;  %vm69_vm5 = vweird.f32 %v63_v27 }
  0x88   :  { %v76_v35 = vor.u32 1.1754944e-38, %v75_v31  ;;  %vm74_vm7 = vcmp.eq.f32.partialorder %v73_v33, 8.507059e+37 }
  0x8c   :  { %v173_v28 = vpop.eup %172 }
  0x8d   :  { %v65_v29 = vmul.f32 %v173_v28, %v63_v27  ;;  %vm70_vm4 = vweird.f32 %v173_v28 }
  0x8e   :  { %vm71_vm6 = vmor %vm69_vm5, %vm70_vm4 }
  0x8f   :  { %v66_v30 = vsub.f32 1.0, %v65_v29 }
  0x91   :  { %v67_v32 = vmul.f32 %v173_v28, %v66_v30 }
  0x93   :  { %v68_v34 = vadd.f32 %v173_v28, %v67_v32 }
  0x95   :  { %v72_v36 = vsel %vm71_vm6, %v173_v28, %v68_v34 }
  0x96   :  { %v77_v37 = vsel %vm74_vm7, %v76_v35, %v72_v36 }
  0x97   :  { %v78_v38 = vmul.f32 %v171_v18, %v77_v37 }
  0x99   :  { %174 = vlog2.f32 %v78_v38 }
  0x9f   :  { %v175_v40 = vpop.eup %174 }
  0xa0   :  { %v80_v42 = vmul.f32 0.6931472, %v175_v40 }
  0xa2   :  { %v81_v44 = vsub.f32 0.0, %v80_v42 }
  0xa4   :  { %v93_v45 = vmul.f32 %v92_v43, %v81_v44 }
  0xa6   :  { %94 = vadd.xlane.f32.xlu1 %v93_v45 }
  0xae   :  { %114 = vadd.xlane.f32.xlu1 %v113_v46 }
 0x119   :  { %v95_v48 = vpop.xlane.xlu1 %94 }
 0x11a   :  { %v96_v49 = vrot.slane %v95_v48, 4 }
 0x11c   :  { %v97_v50 = vadd.f32 %v96_v49, %v95_v48 }
 0x11e   :  { %v98_v51 = vrot.slane %v97_v50, 2 }
 0x120   :  { %v99_v52 = vadd.f32 %v98_v51, %v97_v50 }
 0x121   :  { %v115_v53 = vpop.xlane.xlu1 %114 }
 0x122   :  { %v116_v54 = vrot.slane %v115_v53, 4  ;;  %v100_v55 = vrot.slane %v99_v52, 1 }
 0x124   :  { %v117_v56 = vadd.f32 %v116_v54, %v115_v53  ;;  %v101_v57 = vadd.f32 %v100_v55, %v99_v52 }
 0x126   :  { %v118_v58 = vrot.slane %v117_v56, 2  ;;  %159 = vpush %v101_v57 }
 0x128   :  { %v119_v59 = vadd.f32 %v118_v58, %v117_v56 }
 0x12a   :  { %v120_v60 = vrot.slane %v119_v59, 1 }
 0x12c   :  { %v121_v61 = vadd.f32 %v120_v60, %v119_v59 }
 0x12e   :  { %161 = vpush %v121_v61 }
 0x157   :  { %s160_s4 = spop %159 }
 0x158   :  { %v104_v63 = vstv %s160_s4 }
 0x159   :  { %v105_v0 = vadd.f32 %v104_v63, %v103_v62 }
 0x15b   :  { %107 = vst.msk [vmem:[#allocation3] sm:$0x1] %vm26_vm9, %v105_v0 }
 0x15f   :  { %s162_s25 = spop %161 }
 0x160   :  { %v124_v1 = vstv %s162_s25 }
 0x161   :  { %176 = vrcp.f32 %v124_v1  ;;  %v136_v5 = vand.u32 2147483648, %v124_v1  ;;  %v134_v7 = vand.u32 2147483647, %v124_v1  ;;  %vm130_vm11 = vweird.f32 %v124_v1 }
 0x162   :  { %v123_v11 = vld [vmem:[#allocation3] sm:$0x1] }
 0x163   :  { %v137_v9 = vor.u32 1.1754944e-38, %v136_v5  ;;  %vm135_vm13 = vcmp.eq.f32.partialorder %v134_v7, 8.507059e+37 }
 0x167   :  { %v177_v2 = vpop.eup %176 }
 0x168   :  { %v126_v3 = vmul.f32 %v177_v2, %v124_v1  ;;  %vm131_vm10 = vweird.f32 %v177_v2 }
 0x169   :  { %vm132_vm12 = vmor %vm130_vm11, %vm131_vm10 }
 0x16a   :  { %v127_v4 = vsub.f32 1.0, %v126_v3 }
 0x16c   :  { %v128_v6 = vmul.f32 %v177_v2, %v127_v4 }
 0x16e   :  { %v129_v8 = vadd.f32 %v177_v2, %v128_v6 }
 0x170   :  { %v133_v10 = vsel %vm132_vm12, %v177_v2, %v129_v8 }
 0x171   :  { %v138_v12 = vsel %vm135_vm13, %v137_v9, %v133_v10 }
 0x172   :  { %v139_v13 = vmul.f32 %v138_v12, %v123_v11 }
 0x174   :  { %140 = vst.msk [vmem:[#allocation3] sm:$0x1] %vm26_vm9, %v139_v13 }
 0x175   :  { %151 = dma.vmem_to_hbm [thread:$0]  %s147_s27, 16, %s149_s30, [#allocation4]  }
 0x176   :  { %202 = dma.done.wait [#allocation4], 16  }
 0x177   :  { %203 = vsyncadd [#allocation4], 4294967280 }
 0x178   :  { %156 = vsyncpa [#allocation4], 1 }

</bundles_post_ra>
